<compile_context>
chip_gen: v6e
topology: v6e:2x2x1
jax: 0.10.0
libtpu: 0.0.40
codegen_flags: <defaults>
</compile_context>

<pallas_src>
import functools

import jax
import jax.numpy as jnp
from jax import lax
from jax.experimental import pallas as pl
from jax.experimental.pallas import tpu as pltpu

_SAMPLES_PER_ROW = 128                    # samples packed per lane-dense row
_PACKED_LANES = 2 * _SAMPLES_PER_ROW      # 256: interleaved (x0, x1) pairs


def _activate(y, mode):
    if mode == "relu":
        return jnp.maximum(y, 0.0)
    if mode == "xor":
        # XOR.forward: zero values < 0 or > 1.6, pass through otherwise.
        return jnp.where((y < 0.0) | (y > 1.6), 0.0, y)
    raise NotImplementedError(mode)


def _perceptron_kernel(b_ref, x_ref, w_ref, o_ref, *, mode):
    # b_ref: SMEM (1,)        f32  bias scalar
    # x_ref: VMEM (TR, 256)   input tile, features interleaved along lanes
    # w_ref: VMEM (256, 128)  f32 weight / de-interleave matrix (fetched once)
    # o_ref: VMEM (TR, 128)   output tile (sublane- and lane-dense)
    x = x_ref[...].astype(jnp.float32)
    # One MXU matmul performs both the feature de-interleave and the K=2
    # contraction:  y[r, k] = w0 * x[r, 2k] + w1 * x[r, 2k+1].
    y = jnp.dot(x, w_ref[...], preferred_element_type=jnp.float32)
    y = y + b_ref[0]
    o_ref[...] = _activate(y, mode).astype(o_ref.dtype)


def _round_up(a, b):
    return (a + b - 1) // b * b


def _tile_rows(m, max_rows_per_step):
    # Tiny inputs: one full-extent block (always a legal BlockSpec).
    if m <= 8:
        return m
    # Otherwise: multiple of 8 sublanes, aim for >= ~8 grid steps (keeps both
    # v7x TensorCores busy and the DMA pipeline full), cap per-step footprint.
    return min(max_rows_per_step, max(8, _round_up(pl.cdiv(m, 8), 8)))


@functools.partial(jax.jit,
                   static_argnames=("mode", "use_pallas", "max_rows_per_step"))
def perceptron_forward(x, weight, bias, mode="relu", *, use_pallas=None,
                       max_rows_per_step=2048):
    """Forward pass of Perceptron: Linear(2, 1) + {ReLU | XOR-window}.

    x: (N, 2); weight: (1, 2) (PyTorch Linear layout); bias: (1,).
    Returns (N, 1) in x's dtype (f32 or bf16).
    """
    n, f = x.shape
    assert f == 2, f"Perceptron expects in_features=2, got {f}"

    out_dtype = x.dtype if x.dtype == jnp.bfloat16 else jnp.float32
    if x.dtype != out_dtype:
        x = x.astype(out_dtype)

    w = weight.reshape(2).astype(jnp.float32)
    b = bias.reshape(1).astype(jnp.float32)

    if use_pallas is None:
        use_pallas = n >= (1 << 16)

    if not use_pallas:
        # Small-batch fast path: a fused XLA elementwise expression beats the
        # fixed pallas_call + layout-plumbing cost.
        y = (x[:, 0:1].astype(jnp.float32) * w[0]
             + x[:, 1:2].astype(jnp.float32) * w[1] + b[0])
        return _activate(y, mode).astype(out_dtype)

    # ---------------- Pallas path ----------------
    # Pad only up to a multiple of 128 samples.  When N is already aligned the
    # pad is a no-op and the reshape below is a free re-view of the contiguous
    # row-major data.
    n_pad = _round_up(n, _SAMPLES_PER_ROW)
    if n_pad != n:
        x = jnp.pad(x, ((0, n_pad - n), (0, 0)))
    m = n_pad // _SAMPLES_PER_ROW
    x2 = x.reshape(m, _PACKED_LANES)                     # (M, 256) lane-dense

    # De-interleaving weight matrix: W[2k, k] = w0, W[2k+1, k] = w1, else 0.
    kk = lax.broadcasted_iota(jnp.int32, (_PACKED_LANES, _SAMPLES_PER_ROW), 0)
    cc = lax.broadcasted_iota(jnp.int32, (_PACKED_LANES, _SAMPLES_PER_ROW), 1)
    W = jnp.where(kk == 2 * cc, w[0],
                  jnp.where(kk == 2 * cc + 1, w[1], 0.0)).astype(jnp.float32)

    tr = _tile_rows(m, max_rows_per_step)
    grid = (pl.cdiv(m, tr),)

    bytes_x = x2.size * x2.dtype.itemsize
    bytes_o = m * _SAMPLES_PER_ROW * jnp.dtype(out_dtype).itemsize
    cost = pl.CostEstimate(
        flops=2 * m * _SAMPLES_PER_ROW * _PACKED_LANES,
        transcendentals=0,
        bytes_accessed=bytes_x + bytes_o + W.size * 4,
    )

    out = pl.pallas_call(
        functools.partial(_perceptron_kernel, mode=mode),
        out_shape=jax.ShapeDtypeStruct((m, _SAMPLES_PER_ROW), out_dtype),
        grid=grid,
        in_specs=[
            pl.BlockSpec(memory_space=pltpu.MemorySpace.SMEM),           # bias
            pl.BlockSpec((tr, _PACKED_LANES), lambda i: (i, 0)),         # x tile
            pl.BlockSpec((_PACKED_LANES, _SAMPLES_PER_ROW),
                         lambda i: (0, 0)),                              # W (once)
        ],
        out_specs=pl.BlockSpec((tr, _SAMPLES_PER_ROW), lambda i: (i, 0)),
        compiler_params=pltpu.CompilerParams(
            dimension_semantics=("parallel",),
        ),
        cost_estimate=cost,
    )(b, x2, W)

    out_flat = out.reshape(n_pad)
    if n_pad != n:
        out_flat = out_flat[:n]          # only when N isn't lane-aligned
    return out_flat.reshape(n, 1)


if __name__ == "__main__":
    key = jax.random.PRNGKey(0)
    kx, kb, kx2 = jax.random.split(key, 3)

    # Perceptron.__init__: Linear(2, 1) with weight filled with 1.0; bias keeps
    # the default U(-1/sqrt(2), 1/sqrt(2)) init -> drawn deterministically.
    weight = jnp.ones((1, 2), dtype=jnp.float32)
    bias = jax.random.uniform(
        kb, (1,), dtype=jnp.float32, minval=-(2.0 ** -0.5), maxval=2.0 ** -0.5
    )

    def reference(xin, mode):
        y = xin.astype(jnp.float32) @ weight.T + bias
        if mode == "relu":
            return jnp.maximum(y, 0.0)
        return jnp.where((y < 0.0) | (y > 1.6), 0.0, y)

    # Module-consistent small example (batch=8, in_features=2) plus a ragged
    # batch (1000 -> padded to 1024) to exercise the tiled / masked-tail path.
    x_small = jax.random.normal(kx, (8, 2), dtype=jnp.float32)
    x_ragged = 1.5 * jax.random.normal(kx2, (1000, 2), dtype=jnp.float32)

    for mode in ("relu", "xor"):
        for xin in (x_small, x_ragged):
            out = perceptron_forward(xin, weight, bias, mode=mode,
                                     use_pallas=True)
            out = jax.block_until_ready(out)
            ref = reference(xin, mode)
            assert out.shape == (xin.shape[0], 1), out.shape
            assert jnp.allclose(out, ref, atol=1e-5), (
                f"mismatch mode={mode} n={xin.shape[0]}")
        # Auto-dispatch: small N takes the fused pure-JAX fast path.
        out = jax.block_until_ready(
            perceptron_forward(x_small, weight, bias, mode=mode))
        assert jnp.allclose(out, reference(x_small, mode), atol=1e-5)

    print("KERNEL_OK")
</pallas_src>

<mosaic_0001>
module attributes {stable_mosaic.version = 11 : i64} {
  func.func @_perceptron_kernel(%arg0: i32, %arg1: memref<1xf32, #tpu.memory_space<smem>>, %arg2: memref<1x256xf32, #tpu.memory_space<vmem>>, %arg3: memref<256x128xf32, #tpu.memory_space<vmem>>, %arg4: memref<1x128xf32, #tpu.memory_space<vmem>>) attributes {dimension_semantics = [#tpu.dimension_semantics<parallel>], iteration_bounds = array<i64: 1>, scalar_prefetch = 0 : i64, scratch_operands = 0 : i64, tpu.core_type = #tpu.core_type<tc>, window_params = [{transform_indices = @transform_0, window_bounds = array<i64: 1>}, {transform_indices = @transform_1, window_bounds = array<i64: 1, 256>}, {pipeline_mode = #tpu.pipeline_mode<synchronous>, transform_indices = @transform_2, window_bounds = array<i64: 256, 128>}, {transform_indices = @transform_3, window_bounds = array<i64: 1, 128>}]} {
    %c0 = arith.constant 0 : index
    %c0_0 = arith.constant 0 : index
    %0 = vector.load %arg2[%c0, %c0_0] : memref<1x256xf32, #tpu.memory_space<vmem>>, vector<1x256xf32>
    %c0_1 = arith.constant 0 : index
    %c0_2 = arith.constant 0 : index
    %1 = vector.load %arg3[%c0_1, %c0_2] : memref<256x128xf32, #tpu.memory_space<vmem>>, vector<256x128xf32>
    %cst = arith.constant dense<0.000000e+00> : vector<1x128xf32>
    %2 = tpu.matmul %0, %1, %cst {dimension_numbers = #tpu.dot_dimension_numbers<[1], [0], [0], [1], [0, 0, 1, 1], [], []>} : vector<1x256xf32>, vector<256x128xf32>, vector<1x128xf32> -> vector<1x128xf32>
    %c0_3 = arith.constant 0 : index
    %3 = memref.load %arg1[%c0_3] : memref<1xf32, #tpu.memory_space<smem>>
    %4 = vector.broadcast %3 : f32 to vector<1x128xf32>
    %5 = arith.addf %2, %4 : vector<1x128xf32>
    %cst_4 = arith.constant 0.000000e+00 : f32
    %6 = vector.broadcast %cst_4 : f32 to vector<1x128xf32>
    %7 = arith.maximumf %5, %6 : vector<1x128xf32>
    %c0_5 = arith.constant 0 : index
    %c0_6 = arith.constant 0 : index
    %8 = vector.load %arg4[%c0_5, %c0_6] : memref<1x128xf32, #tpu.memory_space<vmem>>, vector<1x128xf32>
    tpu.vector_store %arg4[%c0_5, %c0_6], %7 {strides = array<i32>} : memref<1x128xf32, #tpu.memory_space<vmem>>, vector<1x128xf32>,
    return
  }
  func.func @transform_0(%arg0: i32) -> i32 {
    %c0_i32 = arith.constant 0 : i32
    %c0_i32_0 = arith.constant 0 : i32
    return %c0_i32 : i32
  }
  func.func @transform_1(%arg0: i32) -> (i32, i32) {
    %c0_i32 = arith.constant 0 : i32
    %c0_i32_0 = arith.constant 0 : i32
    return %arg0, %c0_i32 : i32, i32
  }
  func.func @transform_2(%arg0: i32) -> (i32, i32) {
    %c0_i32 = arith.constant 0 : i32
    %c0_i32_0 = arith.constant 0 : i32
    %c0_i32_1 = arith.constant 0 : i32
    return %c0_i32, %c0_i32_0 : i32, i32
  }
  func.func @transform_3(%arg0: i32) -> (i32, i32) {
    %c0_i32 = arith.constant 0 : i32
    %c0_i32_0 = arith.constant 0 : i32
    return %arg0, %c0_i32 : i32, i32
  }
}

</mosaic_0001>

<bundles_post_ra>
// kernel: perceptron_forward.1
= control target key start
LH: loop header
LB: loop body
LE: loop exit
PB: predicated region body
PF: predicated region fallthrough
CT: control target
= control target key end

     0   :  { %v51_v0 = vlaneseq  ;;  %s297_s2 = inlined_call_operand.vmem [shape: f32[256,128], index: 2, kind: input, shape index: {}]   ;;  %s298_s1 = inlined_call_operand.vmem [shape: f32[1,256], index: 1, kind: input, shape index: {}]   ;;  %s299_s0 = inlined_call_operand.<no memory space> [shape: f32[1], index: 0, kind: input, shape index: {}]   ;;  %s300_s3 = inlined_call_operand.vmem [shape: f32[1,128], index: 3, kind: output, shape index: {}]  }
   0x1   :  { %v47_v1 = vld [vmem:[%s297_s2 + $0xf8] sm:$0xff]  ;;  %v46_v3 = vld [vmem:[%s297_s2 + $0xf0] sm:$0xff]  ;;  %v45_v5 = vld [vmem:[%s297_s2 + $0xe8] sm:$0xff]  ;;  %v49_v40 = vstv %s299_s0 }
   0x2   :  { %v31_v2 = vld [vmem:[%s297_s2 + $0x78] sm:$0xff]  ;;  %137 = vmatprep.subr.mxu0 %v47_v1  ;;  %v30_v4 = vld [vmem:[%s297_s2 + $0x70] sm:$0xff]  ;;  %v29_v6 = vld [vmem:[%s297_s2 + $0x68] sm:$0xff]  ;;  %v52_v7 = vshrl.u32 %v51_v0, 7 }
   0x3   :  { %138 = vmatpush3.msra.mxu0 %v31_v2  ;;  %v44_v8 = vld [vmem:[%s297_s2 + $0xe0] sm:$0xff]  ;;  %v43_v10 = vld [vmem:[%s297_s2 + $0xd8] sm:$0xff]  ;;  %v42_v13 = vld [vmem:[%s297_s2 + $0xd0] sm:$0xff] }
   0x4   :  { %139 = vmatprep.subr.mxu0 %v46_v3  ;;  %v28_v9 = vld [vmem:[%s297_s2 + $0x60] sm:$0xff]  ;;  %v27_v11 = vld [vmem:[%s297_s2 + $0x58] sm:$0xff]  ;;  %v57_v12 = vsub.s32 1, %v52_v7  ;;  %v26_v14 = vld [vmem:[%s297_s2 + $0x50] sm:$0xff]  ;;  %v53_v33 = vsub.s32 0, %v52_v7 }
   0x5   :  { %140 = vmatpush3.msra.mxu0 %v30_v4  ;;  %v41_v15 = vld [vmem:[%s297_s2 + $0xc8] sm:$0xff]  ;;  %v15_v16 = vld [vmem:[%s298_s1] sm:$0x3]  ;;  %v39_v21 = vld [vmem:[%s297_s2 + $0xb8] sm:$0xff] }
   0x6   :  { %141 = vmatprep.subr.mxu0 %v45_v5  ;;  %v25_v17 = vld [vmem:[%s297_s2 + $0x48] sm:$0xff]  ;;  %v58_v18 = vrot.slane %v15_v16, %v57_v12  ;;  %v40_v19 = vld [vmem:[%s297_s2 + $0xc0] sm:$0xff]  ;;  %v23_v22 = vld [vmem:[%s297_s2 + $0x38] sm:$0xff]  ;;  %v54_v38 = vrot.slane %v15_v16, %v53_v33 }
   0x7   :  { %142 = vmatpush3.msra.mxu0 %v29_v6  ;;  %v24_v20 = vld [vmem:[%s297_s2 + $0x40] sm:$0xff]  ;;  %v38_v23 = vld [vmem:[%s297_s2 + $0xb0] sm:$0xff]  ;;  %v37_v25 = vld [vmem:[%s297_s2 + $0xa8] sm:$0xff] }
   0x8   :  { %143 = vmatprep.subr.mxu0 %v44_v8  ;;  %125 = vmatprep.mubr.f32.mxu0 %v58_v18  ;;  %v22_v24 = vld [vmem:[%s297_s2 + $0x30] sm:$0xff]  ;;  %v21_v26 = vld [vmem:[%s297_s2 + $0x28] sm:$0xff]  ;;  %v36_v27 = vld [vmem:[%s297_s2 + $0xa0] sm:$0xff] }
   0x9   :  { %144 = vmatpush3.msra.mxu0 %v28_v9  ;;  %v20_v28 = vld [vmem:[%s297_s2 + $0x20] sm:$0xff]  ;;  %v35_v29 = vld [vmem:[%s297_s2 + $0x98] sm:$0xff]  ;;  %v34_v31 = vld [vmem:[%s297_s2 + $0x90] sm:$0xff] }
   0xa   :  { %145 = vmatprep.subr.mxu0 %v43_v10  ;;  %v19_v30 = vld [vmem:[%s297_s2 + $0x18] sm:$0xff]  ;;  %v18_v32 = vld [vmem:[%s297_s2 + $0x10] sm:$0xff]  ;;  %v33_v34 = vld [vmem:[%s297_s2 + $0x88] sm:$0xff] }
   0xb   :  { %146 = vmatpush3.msra.mxu0 %v27_v11  ;;  %v17_v35 = vld [vmem:[%s297_s2 + $0x8] sm:$0xff]  ;;  %v32_v36 = vld [vmem:[%s297_s2 + $0x80] sm:$0xff] }
   0xc   :  { %147 = vmatprep.subr.mxu0 %v42_v13  ;;  %v16_v37 = vld [vmem:[%s297_s2] sm:$0xff] }
   0xd   :  { %148 = vmatpush3.msra.mxu0 %v26_v14 }
   0xe   :  { %149 = vmatprep.subr.mxu0 %v41_v15 }
   0xf   :  { %150 = vmatpush3.msra.mxu0 %v25_v17 }
  0x10   :  { %151 = vmatprep.subr.mxu0 %v40_v19 }
  0x11   :  { %152 = vmatpush3.msra.mxu0 %v24_v20 }
  0x12   :  { %153 = vmatprep.subr.mxu0 %v39_v21 }
  0x13   :  { %154 = vmatpush3.msra.mxu0 %v23_v22 }
  0x14   :  { %155 = vmatprep.subr.mxu0 %v38_v23 }
  0x15   :  { %156 = vmatpush3.msra.mxu0 %v22_v24 }
  0x16   :  { %157 = vmatprep.subr.mxu0 %v37_v25 }
  0x17   :  { %158 = vmatpush3.msra.mxu0 %v21_v26 }
  0x18   :  { %159 = vmatprep.subr.mxu0 %v36_v27 }
  0x19   :  { %160 = vmatpush3.msra.mxu0 %v20_v28 }
  0x1a   :  { %161 = vmatprep.subr.mxu0 %v35_v29 }
  0x1b   :  { %162 = vmatpush3.msra.mxu0 %v19_v30 }
  0x1c   :  { %163 = vmatprep.subr.mxu0 %v34_v31 }
  0x1d   :  { %164 = vmatpush3.msra.mxu0 %v18_v32 }
  0x1e   :  { %165 = vmatprep.subr.mxu0 %v33_v34 }
  0x1f   :  { %166 = vmatpush3.msra.mxu0 %v17_v35 }
  0x20   :  { %167 = vmatprep.subr.mxu0 %v32_v36 }
  0x21   :  { %168 = vmatpush3.msra.mxu0 %v16_v37 }
  0x22   :  { %126 = vmatmul.mubr.f32.vlgmr.msra.gmra.mxu0 %v54_v38 }
  0xe2   :  { %v169_v39 = vpop.f32.mrf.mxu0 }
  0xe4   :  { %v170_v41 = vpop.f32.mrf.mxu0 }
  0xe5   :  { %v171_v42 = vadd.f32 %v170_v41, %v169_v39 }
  0xe7   :  { %v128_v43 = vadd.f32 %v171_v42, %v49_v40 }
  0xe9   :  { %v131_v44 = vmax.f32 %v128_v43, 0.0 }
  0xeb   :  { %132 = vst [vmem:[%s300_s3] sm:$0x1] %v131_v44 }

</bundles_post_ra>
